<compile_context>
chip_gen: v7x
topology: tpu7x:2x2x1
jax: 0.10.0
libtpu: 0.0.40
codegen_flags: <defaults>
</compile_context>

<pallas_src>
import functools

import jax
import jax.numpy as jnp
from jax.experimental import pallas as pl
from jax.experimental.pallas import tpu as pltpu


def _round_up(x: int, m: int) -> int:
    return ((x + m - 1) // m) * m


# ~0.35 us per grid step expressed in "equivalent HBM bytes" at ~1.2 TB/s.
_STEP_OVERHEAD_BYTES = 400 * 1024


def _choose_batch_tile(b8: int, block_b: int, bytes_per_row: int) -> int:
    """Pick a sublane-aligned batch tile.

    Small batches run as a single tile (one grid step; splitting only adds
    overhead). Large batches use a tile that is a multiple of 256 (MXU-friendly
    on v5e's 128- and v6e/v7x's 256-wide arrays), capped at ~half the batch so
    the grid has >= 2 steps and both v7x TensorCores get work; among candidates
    we minimize padded HBM traffic + per-step pipeline overhead.
    """
    block_b = max(256, (block_b // 256) * 256)
    if b8 <= min(block_b, 1024):
        return b8
    cap = min(block_b, _round_up(pl.cdiv(b8, 2), 256))
    best_t, best_cost = 256, None
    for t in range(256, cap + 1, 256):
        steps = pl.cdiv(b8, t)
        cost = steps * t * bytes_per_row + steps * _STEP_OVERHEAD_BYTES
        if best_cost is None or cost < best_cost:
            best_t, best_cost = t, cost
    return best_t


def qvalue_kernel(x_ref, w1_ref, b1_ref, w2_ref, b2_ref, out_ref):
    # Cast x to bf16 in-kernel (cheap VPU op, hidden under the tile DMA) so the
    # wrapper never makes a separate HBM pass over x.
    x = x_ref[...].astype(jnp.bfloat16)
    # Layer 1 on the MXU with f32 accumulation; bias + ReLU in f32.
    h = jnp.dot(x, w1_ref[...], preferred_element_type=jnp.float32)
    h = jnp.maximum(h + b1_ref[...], 0.0)          # b1 is (1, H), broadcasts
    # Layer 2 on the MXU; f32 accumulation + bias, cast only at the store.
    o = jnp.dot(h.astype(jnp.bfloat16), w2_ref[...],
                preferred_element_type=jnp.float32)
    out_ref[...] = (o + b2_ref[...]).astype(out_ref.dtype)


def pack_qvalue_params(w1, b1, w2, b2):
    """One-time weight prep hoisted out of the per-call path.

    w1: [S, H]; b1: [H]; w2: [H, A]; b2: [A]  ->  (w1_bf16, b1_f32[1,H],
    w2_bf16[H, A_pad], b2_f32[1, A_pad]) with A padded up to a multiple of 128
    so the kernel's output store is lane-dense and unmasked.
    """
    S, H = w1.shape
    A = w2.shape[1]
    a_pad = _round_up(max(A, 128), 128)
    w1_bf = w1.astype(jnp.bfloat16)
    b1_r = b1.astype(jnp.float32).reshape(1, H)
    w2_bf = jnp.pad(w2.astype(jnp.float32), ((0, 0), (0, a_pad - A))).astype(jnp.bfloat16)
    b2_r = jnp.pad(b2.astype(jnp.float32), (0, a_pad - A)).reshape(1, a_pad)
    return (w1_bf, b1_r, w2_bf, b2_r)


def qvalue_forward(state, packed, *, action_size, block_b: int = 2048):
    """state: [B, S] f32; packed from pack_qvalue_params -> [B, action_size] f32."""
    w1_bf, b1_r, w2_bf, b2_r = packed
    B, S = state.shape
    H = w1_bf.shape[1]
    A_pad = w2_bf.shape[1]

    B8 = _round_up(B, 8)
    bytes_per_row = S * 4 + A_pad * 2          # f32 x read + bf16 out write
    bt = _choose_batch_tile(B8, block_b, bytes_per_row)
    B_pad = _round_up(B8, bt)

    x = state
    if B_pad != B:
        # Padded rows produce garbage values but are sliced off below; rows are
        # independent through both matmuls so valid rows are unaffected.
        x = jnp.pad(x, ((0, B_pad - B), (0, 0)))

    grid = (B_pad // bt,)
    out = pl.pallas_call(
        qvalue_kernel,
        out_shape=jax.ShapeDtypeStruct((B_pad, A_pad), jnp.bfloat16),
        grid=grid,
        in_specs=[
            pl.BlockSpec((bt, S), lambda i: (i, 0)),        # x: tiled over batch
            pl.BlockSpec((S, H), lambda i: (0, 0)),         # w1: VMEM-resident
            pl.BlockSpec((1, H), lambda i: (0, 0)),         # b1: VMEM-resident
            pl.BlockSpec((H, A_pad), lambda i: (0, 0)),     # w2: VMEM-resident
            pl.BlockSpec((1, A_pad), lambda i: (0, 0)),     # b2: VMEM-resident
        ],
        out_specs=pl.BlockSpec((bt, A_pad), lambda i: (i, 0)),
        compiler_params=pltpu.CompilerParams(
            dimension_semantics=("parallel",)),             # shard tiles on v7x
    )(x, w1_bf, b1_r, w2_bf, b2_r)

    # Slice off batch/action padding; return f32 like the torch module (the
    # slice + convert fuse into one tiny op over B x action_size elements).
    return out[:B, :action_size].astype(jnp.float32)


def init_qvalue_params(key, state_size, action_size, hidden=128):
    # Deterministic init mimicking torch.nn.Linear's U(-1/sqrt(fan_in), +).
    k1, k2, k3, k4 = jax.random.split(key, 4)
    bound1 = 1.0 / jnp.sqrt(jnp.float32(state_size))
    bound2 = 1.0 / jnp.sqrt(jnp.float32(hidden))
    w1 = jax.random.uniform(k1, (state_size, hidden), jnp.float32, -bound1, bound1)
    b1 = jax.random.uniform(k2, (hidden,), jnp.float32, -bound1, bound1)
    w2 = jax.random.uniform(k3, (hidden, action_size), jnp.float32, -bound2, bound2)
    b2 = jax.random.uniform(k4, (action_size,), jnp.float32, -bound2, bound2)
    return w1, b1, w2, b2


if __name__ == "__main__":
    key = jax.random.PRNGKey(0)
    batch = 8
    state_size = 32
    action_size = 4

    k_params, k_state = jax.random.split(key)
    w1, b1, w2, b2 = init_qvalue_params(k_params, state_size, action_size)
    packed = pack_qvalue_params(w1, b1, w2, b2)          # one-time weight prep
    state = jax.random.normal(k_state, (batch, state_size), jnp.float32)

    fwd = jax.jit(functools.partial(qvalue_forward, action_size=action_size))
    out = fwd(state, packed)
    jax.block_until_ready(out)
    assert out.shape == (batch, action_size)
    assert out.dtype == jnp.float32

    # Cross-check against a plain-JAX reference mirroring the kernel arithmetic
    # (bf16 operands, f32 accumulate + bias, bf16 store).
    def ref_fn(s):
        h = jnp.maximum(
            jnp.dot(s.astype(jnp.bfloat16), packed[0],
                    preferred_element_type=jnp.float32) + packed[1], 0.0)
        o = jnp.dot(h.astype(jnp.bfloat16), packed[2],
                    preferred_element_type=jnp.float32) + packed[3]
        return o.astype(jnp.bfloat16)[:, :action_size].astype(jnp.float32)

    ref = ref_fn(state)
    assert jnp.allclose(out, ref, atol=2e-3, rtol=2e-3)

    # Sanity vs the full-f32 torch-equivalent forward (loose tol for bf16 path).
    ref_f32 = jnp.maximum(state @ w1 + b1, 0.0) @ w2 + b2
    assert jnp.allclose(out, ref_f32, atol=5e-2, rtol=5e-2)

    # Also exercise the multi-tile / batch-padding path once (ragged batch).
    big_b = 1283
    big_state = jax.random.normal(k_state, (big_b, state_size), jnp.float32)
    big_out = qvalue_forward(big_state, packed, action_size=action_size, block_b=512)
    jax.block_until_ready(big_out)
    big_ref = jnp.maximum(big_state @ w1 + b1, 0.0) @ w2 + b2
    assert big_out.shape == (big_b, action_size)
    assert jnp.allclose(big_out, big_ref, atol=5e-2, rtol=5e-2)

    print("KERNEL_OK")
</pallas_src>

<mosaic_0001>
module attributes {stable_mosaic.version = 11 : i64} {
  func.func @qvalue_kernel(%arg0: i32, %arg1: memref<8x32xf32, #tpu.memory_space<vmem>>, %arg2: memref<32x128xbf16, #tpu.memory_space<vmem>>, %arg3: memref<1x128xf32, #tpu.memory_space<vmem>>, %arg4: memref<128x128xbf16, #tpu.memory_space<vmem>>, %arg5: memref<1x128xf32, #tpu.memory_space<vmem>>, %arg6: memref<8x128xbf16, #tpu.memory_space<vmem>>) attributes {dimension_semantics = [#tpu.dimension_semantics<parallel>], iteration_bounds = array<i64: 1>, scalar_prefetch = 0 : i64, scratch_operands = 0 : i64, tpu.core_type = #tpu.core_type<tc>, window_params = [{transform_indices = @transform_0, window_bounds = array<i64: 8, 32>}, {pipeline_mode = #tpu.pipeline_mode<synchronous>, transform_indices = @transform_1, window_bounds = array<i64: 32, 128>}, {pipeline_mode = #tpu.pipeline_mode<synchronous>, transform_indices = @transform_2, window_bounds = array<i64: 1, 128>}, {pipeline_mode = #tpu.pipeline_mode<synchronous>, transform_indices = @transform_3, window_bounds = array<i64: 128, 128>}, {pipeline_mode = #tpu.pipeline_mode<synchronous>, transform_indices = @transform_4, window_bounds = array<i64: 1, 128>}, {transform_indices = @transform_5, window_bounds = array<i64: 8, 128>}]} {
    %c0 = arith.constant 0 : index
    %c0_0 = arith.constant 0 : index
    %0 = vector.load %arg1[%c0, %c0_0] : memref<8x32xf32, #tpu.memory_space<vmem>>, vector<8x32xf32>
    %1 = arith.truncf %0 : vector<8x32xf32> to vector<8x32xbf16>
    %c0_1 = arith.constant 0 : index
    %c0_2 = arith.constant 0 : index
    %2 = vector.load %arg2[%c0_1, %c0_2] : memref<32x128xbf16, #tpu.memory_space<vmem>>, vector<32x128xbf16>
    %cst = arith.constant dense<0.000000e+00> : vector<8x128xf32>
    %3 = tpu.matmul %1, %2, %cst {dimension_numbers = #tpu.dot_dimension_numbers<[1], [0], [0], [1], [0, 0, 1, 1], [], []>} : vector<8x32xbf16>, vector<32x128xbf16>, vector<8x128xf32> -> vector<8x128xf32>
    %c0_3 = arith.constant 0 : index
    %c0_4 = arith.constant 0 : index
    %4 = vector.load %arg3[%c0_3, %c0_4] : memref<1x128xf32, #tpu.memory_space<vmem>>, vector<1x128xf32>
    %5 = vector.broadcast %4 : vector<1x128xf32> to vector<8x128xf32>
    %6 = arith.addf %3, %5 : vector<8x128xf32>
    %cst_5 = arith.constant 0.000000e+00 : f32
    %7 = vector.broadcast %cst_5 : f32 to vector<8x128xf32>
    %8 = arith.maximumf %6, %7 : vector<8x128xf32>
    %9 = arith.truncf %8 : vector<8x128xf32> to vector<8x128xbf16>
    %c0_6 = arith.constant 0 : index
    %c0_7 = arith.constant 0 : index
    %10 = vector.load %arg4[%c0_6, %c0_7] : memref<128x128xbf16, #tpu.memory_space<vmem>>, vector<128x128xbf16>
    %cst_8 = arith.constant dense<0.000000e+00> : vector<8x128xf32>
    %11 = tpu.matmul %9, %10, %cst_8 {dimension_numbers = #tpu.dot_dimension_numbers<[1], [0], [0], [1], [0, 0, 1, 1], [], []>} : vector<8x128xbf16>, vector<128x128xbf16>, vector<8x128xf32> -> vector<8x128xf32>
    %c0_9 = arith.constant 0 : index
    %c0_10 = arith.constant 0 : index
    %12 = vector.load %arg5[%c0_9, %c0_10] : memref<1x128xf32, #tpu.memory_space<vmem>>, vector<1x128xf32>
    %13 = vector.broadcast %12 : vector<1x128xf32> to vector<8x128xf32>
    %14 = arith.addf %11, %13 : vector<8x128xf32>
    %15 = arith.truncf %14 : vector<8x128xf32> to vector<8x128xbf16>
    %c0_11 = arith.constant 0 : index
    %c0_12 = arith.constant 0 : index
    %16 = vector.load %arg6[%c0_11, %c0_12] : memref<8x128xbf16, #tpu.memory_space<vmem>>, vector<8x128xbf16>
    tpu.vector_store %arg6[%c0_11, %c0_12], %15 {strides = array<i32>} : memref<8x128xbf16, #tpu.memory_space<vmem>>, vector<8x128xbf16>,
    return
  }
  func.func @transform_0(%arg0: i32) -> (i32, i32) {
    %c0_i32 = arith.constant 0 : i32
    %c0_i32_0 = arith.constant 0 : i32
    return %arg0, %c0_i32 : i32, i32
  }
  func.func @transform_1(%arg0: i32) -> (i32, i32) {
    %c0_i32 = arith.constant 0 : i32
    %c0_i32_0 = arith.constant 0 : i32
    %c0_i32_1 = arith.constant 0 : i32
    return %c0_i32, %c0_i32_0 : i32, i32
  }
  func.func @transform_2(%arg0: i32) -> (i32, i32) {
    %c0_i32 = arith.constant 0 : i32
    %c0_i32_0 = arith.constant 0 : i32
    %c0_i32_1 = arith.constant 0 : i32
    return %c0_i32, %c0_i32_0 : i32, i32
  }
  func.func @transform_3(%arg0: i32) -> (i32, i32) {
    %c0_i32 = arith.constant 0 : i32
    %c0_i32_0 = arith.constant 0 : i32
    %c0_i32_1 = arith.constant 0 : i32
    return %c0_i32, %c0_i32_0 : i32, i32
  }
  func.func @transform_4(%arg0: i32) -> (i32, i32) {
    %c0_i32 = arith.constant 0 : i32
    %c0_i32_0 = arith.constant 0 : i32
    %c0_i32_1 = arith.constant 0 : i32
    return %c0_i32, %c0_i32_0 : i32, i32
  }
  func.func @transform_5(%arg0: i32) -> (i32, i32) {
    %c0_i32 = arith.constant 0 : i32
    %c0_i32_0 = arith.constant 0 : i32
    return %arg0, %c0_i32 : i32, i32
  }
}

</mosaic_0001>

<bundles_post_ra>
// kernel: qvalue_forward.1
= control target key start
LH: loop header
LB: loop body
LE: loop exit
PB: predicated region body
PF: predicated region fallthrough
CT: control target
= control target key end

     0   :  { %10 = vsyncpa [#allocation3], 0  ;;  %s478_s0 = inlined_call_operand.hbm [shape: f32[8,32], index: 0, kind: input, shape index: {}]   ;;  %s479_s1 = inlined_call_operand.hbm [shape: bf16[32,128], index: 1, kind: input, shape index: {}]   ;;  %s480_s2 = inlined_call_operand.vmem [shape: f32[1,128], index: 2, kind: input, shape index: {}]   ;;  %s481_s3 = inlined_call_operand.hbm [shape: bf16[128,128], index: 3, kind: input, shape index: {}]   ;;  %s482_s4 = inlined_call_operand.vmem [shape: f32[1,128], index: 4, kind: input, shape index: {}]   ;;  %s483_s5 = inlined_call_operand.vmem [shape: bf16[8,128], index: 5, kind: output, shape index: {}]  }
   0x1   :  { %11 = vsyncpa [#allocation5], 0  ;;  %s390_s18 = smov [#allocation4]   ;;  %s320_s22 = scalar_lea.hbm %s479_s1, 256 }
   0x2   :  { %s27_s19 = sshll.u32 %s390_s18, 4  ;;  %p321_p0 = scmp.ne.s32.totalorder %s479_s1, %s320_s22  ;;  %s28_s19 = int_to_ptr.vmem [resolvable:$true] %s27_s19 }
   0x3   :  { %p324_p1 = scmp.lt.u32.totalorder %s320_s22, %s479_s1 }
   0x5   :  { %p326_p2 = pnand %p324_p1, %p321_p0 }
   0x7   :  { %329 = shalt.err (!%p326_p2)
}
   0x8   :  { %s330_s27 = scalar_lea.vmem %s28_s19, 256  ;;  %p335_p4 = scmp.lt.s32.totalorder %s28_s19, %s28_s19 }
   0x9   :  { %p331_p3 = scmp.ne.s32.totalorder %s28_s19, %s330_s27  ;;  %p336_p5 = scmp.lt.s32.totalorder %s330_s27, %s330_s27 }
   0xb   :  { %p337_p6 = por %p336_p5, %p335_p4 }
   0xd   :  { %p338_p7 = pnand %p337_p6, %p331_p3 }
   0xf   :  { %341 = shalt.err (!%p338_p7)
}
  0x10   :  { %s391_s28 = smov 64   ;;  %s392_s29 = smov 4  }
  0x11   :  { %33 = dma.hbm_to_vmem [thread:$0]  %s479_s1, 256, %s28_s19, [#allocation5], %s391_s28, %s391_s28, %s392_s29  }
  0x12   :  { %s393_s7 = smov [#allocation2]   ;;  %s394_s9 = smov [#allocation6]  }
  0x13   :  { %s18_s8 = sshll.u32 %s393_s7, 4  ;;  %s41_s10 = sshll.u32 %s394_s9, 4  ;;  %s19_s8 = int_to_ptr.vmem [resolvable:$true] %s18_s8  ;;  %s42_s10 = int_to_ptr.vmem [resolvable:$true] %s41_s10 }
  0x14   :  { %s342_s13 = scalar_lea.hbm %s478_s0, 128 }
  0x15   :  { %p343_p8 = scmp.ne.s32.totalorder %s478_s0, %s342_s13  ;;  %p346_p9 = scmp.lt.u32.totalorder %s342_s13, %s478_s0 }
  0x17   :  { %p348_p10 = pnand %p346_p9, %p343_p8 }
  0x19   :  { %351 = shalt.err (!%p348_p10)
}
  0x1a   :  { %s352_s1 = scalar_lea.vmem %s19_s8, 128  ;;  %p357_p12 = scmp.lt.s32.totalorder %s19_s8, %s19_s8 }
  0x1b   :  { %p353_p11 = scmp.ne.s32.totalorder %s19_s8, %s352_s1  ;;  %p358_p13 = scmp.lt.s32.totalorder %s352_s1, %s352_s1 }
  0x1d   :  { %p359_p0 = por %p358_p13, %p357_p12 }
  0x1f   :  { %p360_p1 = pnand %p359_p0, %p353_p11 }
  0x21   :  { %363 = shalt.err (!%p360_p1)
}
  0x22   :  { %21 = dma.hbm_to_vmem [thread:$0]  %s478_s0, 128, %s19_s8, [#allocation3]  }
  0x23   :  { %s364_s22 = scalar_lea.hbm %s481_s3, 1024 }
  0x24   :  { %p365_p2 = scmp.ne.s32.totalorder %s481_s3, %s364_s22  ;;  %p368_p3 = scmp.lt.u32.totalorder %s364_s22, %s481_s3 }
  0x26   :  { %p370_p4 = pnand %p368_p3, %p365_p2 }
  0x28   :  { %373 = shalt.err (!%p370_p4)
}
  0x29   :  { %s374_s27 = scalar_lea.vmem %s42_s10, 1024  ;;  %p379_p6 = scmp.lt.s32.totalorder %s42_s10, %s42_s10 }
  0x2a   :  { %p375_p5 = scmp.ne.s32.totalorder %s42_s10, %s374_s27  ;;  %p380_p7 = scmp.lt.s32.totalorder %s374_s27, %s374_s27 }
  0x2c   :  { %p381_p8 = por %p380_p7, %p379_p6 }
  0x2e   :  { %p382_p9 = pnand %p381_p8, %p375_p5 }
  0x30   :  { %385 = shalt.err (!%p382_p9)
}
  0x31   :  { %47 = dma.hbm_to_vmem [thread:$0]  %s481_s3, 1024, %s42_s10, [#allocation5], %s391_s28, %s391_s28, %s392_s29  }
  0x32   :  { %386 = dma.done.wait [#allocation3], 128  }
  0x33   :  { %387 = vsyncadd [#allocation3], 4294967168 }
  0x34   :  { %388 = dma.done.wait [#allocation5], 1280  }
  0x35   :  { %389 = vsyncadd [#allocation5], 4294966016  ;;  %v395_v0 = vmov 0.0   ;;  %vm396_vm0 = vmmov 0   ;;  %v310_v1 = vld [vmem:[#allocation4] sm:$0xff]   ;;  %v311_v2 = vld [vmem:[#allocation4 + $0x8] sm:$0xff]  }
  0x36   :  { %275 = vmatprep.subr.bf16.mxu0 %v395_v0  ;;  %279 = vmatprep.mubr.msk.bf16.mxu0 %vm396_vm0, %v395_v0  ;;  %v60_v3 = vld [vmem:[#allocation2] sm:$0xff]  ;;  %v312_v4 = vld [vmem:[#allocation6] sm:$0xff]   ;;  %vm85_vm1 = vcmask 261120   ;;  %v314_v7 = vld [vmem:[#allocation6 + $0x10] sm:$0xff]  }
  0x37   :  { %283 = vmatprep.subr.bf16.mxu1 %v395_v0  ;;  %299 = vmatprep.mubr.msk.bf16.mxu1 %vm396_vm0, %v395_v0  ;;  %v61_v5 = vpack.c.bf16 %v60_v3, %v60_v3  ;;  %v313_v6 = vld [vmem:[#allocation6 + $0x8] sm:$0xff]   ;;  %v315_v8 = vld [vmem:[#allocation6 + $0x18] sm:$0xff]   ;;  %v316_v9 = vld [vmem:[#allocation6 + $0x20] sm:$0xff]  }
  0x38   :  { %276 = vmatpush3.bf16.msra.mxu0 %v310_v1  ;;  %284 = vmatpush3.bf16.msra.mxu1 %v312_v4  ;;  %v317_v10 = vld [vmem:[#allocation6 + $0x28] sm:$0xff]   ;;  %v318_v11 = vld [vmem:[#allocation6 + $0x30] sm:$0xff]   ;;  %v319_v12 = vld [vmem:[#allocation6 + $0x38] sm:$0xff]  }
  0x39   :  { %277 = vmatprep.subr.bf16.mxu0 %v395_v0  ;;  %285 = vmatprep.subr.bf16.mxu1 %v395_v0  ;;  %v250_v13 = vld [vmem:[%s480_s2] ss:$0 sm:$0xff] }
  0x3a   :  { %v254_v21 = vld [vmem:[%s482_s4] ss:$0 sm:$0xff] }
  0x3c   :  { %278 = vmatpush3.bf16.msra.mxu0 %v311_v2  ;;  %286 = vmatpush3.bf16.msra.mxu1 %v313_v6 }
  0x3d   :  { %287 = vmatprep.subr.bf16.mxu1 %v395_v0 }
  0x3f   :  { %280 = vmatmul.mubr.msk.bf16.vlgmr.msra.gmra.mrb[0].mxu0 %vm85_vm1, %v61_v5 }
  0x40   :  { %288 = vmatpush3.bf16.msra.mxu1 %v314_v7 }
  0x41   :  { %289 = vmatprep.subr.bf16.mxu1 %v395_v0 }
  0x44   :  { %290 = vmatpush3.bf16.msra.mxu1 %v315_v8 }
  0x45   :  { %291 = vmatprep.subr.bf16.mxu1 %v395_v0 }
  0x48   :  { %292 = vmatpush3.bf16.msra.mxu1 %v316_v9 }
  0x49   :  { %293 = vmatprep.subr.bf16.mxu1 %v395_v0 }
  0x4c   :  { %294 = vmatpush3.bf16.msra.mxu1 %v317_v10 }
  0x4d   :  { %295 = vmatprep.subr.bf16.mxu1 %v395_v0 }
  0x50   :  { %296 = vmatpush3.bf16.msra.mxu1 %v318_v11 }
  0x51   :  { %297 = vmatprep.subr.bf16.mxu1 %v395_v0 }
  0x54   :  { %298 = vmatpush3.bf16.msra.mxu1 %v319_v12 }
 0x112   :  { %v123_v14 = vpop.f32.mrb[0].mxu0 }
 0x113   :  { %v124_v15 = vadd.f32 %v250_v13, %v123_v14  ;;  %v281_v16 = vpop.f32.mrb[1].mxu0 }
 0x114   :  { %v126_v17 = vpop.f32.mrb[2].mxu0 }
 0x115   :  { %v129_v18 = vmax.f32 %v124_v15, 0.0  ;;  %v282_v19 = vpop.f32.mrb[3].mxu0 }
 0x117   :  { %v130_v20 = vpack.c.bf16 %v129_v18, %v129_v18 }
 0x119   :  { %300 = vmatmul.mubr.bf16.vlgmr.msra.gmra.mrb[0].mxu1 %v130_v20 }
 0x1ec   :  { %v236_v22 = vpop.f32.mrb[0].mxu1 }
 0x1ed   :  { %v237_v23 = vadd.f32 %v254_v21, %v236_v22  ;;  %v301_v24 = vpop.f32.mrb[1].mxu1 }
 0x1ee   :  { %v239_v25 = vpop.f32.mrb[2].mxu1 }
 0x1ef   :  { %v242_v26 = vpack.c.bf16 %v237_v23, %v237_v23  ;;  %v302_v27 = vpop.f32.mrb[3].mxu1 }
 0x1f1   :  { %243 = vst [vmem:[%s483_s5] sm:$0xf] %v242_v26 }
 0x1f2   :  { %248 = vsyncpa [#allocation3], 1 }
 0x1f3   :  { %249 = vsyncpa [#allocation5], 1 }

</bundles_post_ra>
